<compile_context>
chip_gen: v7x
topology: tpu7x:2x2x1
jax: 0.10.0
libtpu: 0.0.40
codegen_flags: <defaults>
</compile_context>

<pallas_src>
import functools
import math

import jax
import jax.numpy as jnp
from jax.experimental import pallas as pl
from jax.experimental.pallas import tpu as pltpu


def _round_up(x, m):
    return (x + m - 1) // m * m


# ----------------------------------------------------------------------------
# Pallas kernel
# ----------------------------------------------------------------------------
def _decoder_kernel(x1_ref, x2_ref, w1a_ref, w1b_ref, b1a_ref, b1b_ref,
                    w2_ref, b2_ref, o_ref):
    """out[n, t] = relu(h1[n] + h2[t]) . w2 + b2 for one row tile of input1."""
    # h1: (TM, Hp) -- bf16 operands on the MXU, f32 accumulation, f32 bias.
    h1 = jnp.dot(x1_ref[...], w1a_ref[...],
                 preferred_element_type=jnp.float32) + b1a_ref[...]
    # h2: (Tp, Hp) -- tiny; recomputed per row tile so the grid axis can be
    # megacore-parallel without cross-iteration scratch state.
    h2 = jnp.dot(x2_ref[...], w1b_ref[...],
                 preferred_element_type=jnp.float32) + b1b_ref[...]
    # relu over every (row, type) pair, then reduce over the hidden (lane) axis.
    r = jnp.maximum(h1[:, None, :] + h2[None, :, :], 0.0)       # (TM, Tp, Hp) f32
    w2 = w2_ref[...][None]                                       # (1, 1, Hp)
    out = jnp.sum(r * w2, axis=-1) + b2_ref[0]                   # (TM, Tp)
    o_ref[...] = out.astype(o_ref.dtype)


@functools.lru_cache(maxsize=None)
def _build_decoder_call(TM, Np, Tp, Dp, Hp):
    grid = (Np // TM,)
    return pl.pallas_call(
        _decoder_kernel,
        out_shape=jax.ShapeDtypeStruct((Np, Tp), jnp.float32),
        grid_spec=pltpu.PrefetchScalarGridSpec(
            num_scalar_prefetch=0,
            grid=grid,
            in_specs=[
                pl.BlockSpec((TM, Dp), lambda i: (i, 0)),   # input1 row tile (bf16)
                pl.BlockSpec((Tp, Dp), lambda i: (0, 0)),   # input2 (bf16, resident)
                pl.BlockSpec((Dp, Hp), lambda i: (0, 0)),   # W1a^T (bf16, resident)
                pl.BlockSpec((Dp, Hp), lambda i: (0, 0)),   # W1b^T (bf16, resident)
                pl.BlockSpec((1, Hp), lambda i: (0, 0)),    # b1a (f32)
                pl.BlockSpec((1, Hp), lambda i: (0, 0)),    # b1b (f32)
                pl.BlockSpec((1, Hp), lambda i: (0, 0)),    # w2 row (f32)
                pl.BlockSpec(memory_space=pltpu.MemorySpace.SMEM),  # b2 scalar
            ],
            out_specs=pl.BlockSpec((TM, Tp), lambda i: (i, 0)),
        ),
        compiler_params=pltpu.CompilerParams(
            dimension_semantics=("parallel",)),
    )


# ----------------------------------------------------------------------------
# Parameters: torch-style init + one-time padding / layout / bf16 cast
# ----------------------------------------------------------------------------
def init_mlp_decoder_params(key, input_dim, hid_dim=20, issymmetric=True, bias=True):
    in1 = input_dim if issymmetric else 2 * input_dim
    k1, k2, k3, k4 = jax.random.split(key, 4)
    bnd1 = 1.0 / math.sqrt(in1)
    bnd2 = 1.0 / math.sqrt(hid_dim)
    w1 = jax.random.uniform(k1, (hid_dim, in1), jnp.float32, -bnd1, bnd1)
    b1 = (jax.random.uniform(k2, (hid_dim,), jnp.float32, -bnd1, bnd1)
          if bias else jnp.zeros((hid_dim,), jnp.float32))
    w2 = jax.random.uniform(k3, (1, hid_dim), jnp.float32, -bnd2, bnd2)
    b2 = (jax.random.uniform(k4, (1,), jnp.float32, -bnd2, bnd2)
          if bias else jnp.zeros((1,), jnp.float32))
    return {"w1": w1, "b1": b1, "w2": w2, "b2": b2,
            "issymmetric": issymmetric, "input_dim": input_dim}


def prepare_padded_params(raw):
    """Pre-pad / pre-transpose / pre-cast the weights once (outside the jitted fwd)."""
    w1, b1, w2, b2 = raw["w1"], raw["b1"], raw["w2"], raw["b2"]
    H = w1.shape[0]
    D = raw["input_dim"]
    if raw["issymmetric"]:
        w1a_t, w1b_t = w1.T, w1.T
        b1b = b1
    else:
        w1a_t, w1b_t = w1[:, :D].T, w1[:, D:].T
        b1b = jnp.zeros_like(b1)
    Dp, Hp = _round_up(D, 128), _round_up(H, 128)

    def pad_mat(m):   # (D, H) -> (Dp, Hp) bf16
        return jnp.zeros((Dp, Hp), jnp.bfloat16).at[:D, :H].set(m.astype(jnp.bfloat16))

    def pad_row(v):   # (H,) -> (1, Hp) f32
        return jnp.zeros((1, Hp), jnp.float32).at[0, :H].set(v.astype(jnp.float32))

    return {"w1a": pad_mat(w1a_t), "w1b": pad_mat(w1b_t),
            "b1a": pad_row(b1), "b1b": pad_row(b1b),
            "w2": pad_row(w2.reshape(-1)),
            "b2": b2.reshape((1,)).astype(jnp.float32)}


# ----------------------------------------------------------------------------
# Forward
# ----------------------------------------------------------------------------
def mlp_decoder_forward(padded, input1, input2, type_index=None, act=lambda x: x):
    # type_index is unused by the reference forward (kept for signature parity).
    N, D = input1.shape
    T = input2.shape[0]
    Dp, Hp = padded["w1a"].shape
    assert D <= Dp

    TM = 128 if N >= 128 else _round_up(max(N, 1), 8)
    Np = _round_up(N, TM)
    Tp = _round_up(max(T, 1), 8)

    # Only the activations are padded / cast per call (bf16 halves A-operand DMA).
    x1 = jnp.zeros((Np, Dp), jnp.bfloat16).at[:N, :D].set(input1.astype(jnp.bfloat16))
    x2 = jnp.zeros((Tp, Dp), jnp.bfloat16).at[:T, :D].set(input2.astype(jnp.bfloat16))

    fn = _build_decoder_call(TM, Np, Tp, Dp, Hp)
    out = fn(x1, x2, padded["w1a"], padded["w1b"],
             padded["b1a"], padded["b1b"], padded["w2"], padded["b2"])
    # TODO(synk): `act` is an arbitrary Python callable in the reference module;
    # it is applied outside the kernel (identity by default) rather than fused.
    return act(out[:N, :T])


# ----------------------------------------------------------------------------
# Pure-JAX reference (mirrors the PyTorch loop) for verification
# ----------------------------------------------------------------------------
def reference_forward(raw, input1, input2):
    w1, b1, w2, b2 = raw["w1"], raw["b1"], raw["w2"], raw["b2"]
    outs = []
    for t in range(input2.shape[0]):
        row = jnp.broadcast_to(input2[t], input1.shape)
        if raw["issymmetric"]:
            o = (input1 @ w1.T + b1) + (row @ w1.T + b1)
        else:
            o = jnp.concatenate([input1, row], axis=1) @ w1.T + b1
        o = jnp.maximum(o, 0.0)
        outs.append(o @ w2.T + b2)
    return jnp.concatenate(outs, axis=1)


if __name__ == "__main__":
    # Small shapes implied by the module: input1 (N, input_dim), input2 (num_types, input_dim).
    N, D, T, H = 8, 32, 4, 20
    key = jax.random.PRNGKey(0)
    k_in1, k_in2, k_p1, k_p2 = jax.random.split(key, 4)
    input1 = jax.random.normal(k_in1, (N, D), jnp.float32)
    input2 = jax.random.normal(k_in2, (T, D), jnp.float32)
    type_index = jnp.arange(T, dtype=jnp.int32)

    fwd = jax.jit(mlp_decoder_forward)

    # symmetric decoder (module default)
    raw_s = init_mlp_decoder_params(k_p1, D, hid_dim=H, issymmetric=True, bias=True)
    pad_s = prepare_padded_params(raw_s)
    out_s = jax.block_until_ready(fwd(pad_s, input1, input2, type_index))
    ref_s = reference_forward(raw_s, input1, input2)
    assert out_s.shape == (N, T), out_s.shape
    assert bool(jnp.all(jnp.isfinite(out_s)))
    assert bool(jnp.allclose(out_s, ref_s, rtol=5e-2, atol=5e-2))

    # asymmetric decoder (cat([input1, type_row], dim=1) path)
    raw_a = init_mlp_decoder_params(k_p2, D, hid_dim=H, issymmetric=False, bias=True)
    pad_a = prepare_padded_params(raw_a)
    out_a = jax.block_until_ready(fwd(pad_a, input1, input2, type_index))
    ref_a = reference_forward(raw_a, input1, input2)
    assert out_a.shape == (N, T), out_a.shape
    assert bool(jnp.all(jnp.isfinite(out_a)))
    assert bool(jnp.allclose(out_a, ref_a, rtol=5e-2, atol=5e-2))

    print("KERNEL_OK")
</pallas_src>

<mosaic_0001>
module attributes {stable_mosaic.version = 11 : i64} {
  func.func @_decoder_kernel(%arg0: i32, %arg1: memref<8x128xbf16, #tpu.memory_space<vmem>>, %arg2: memref<8x128xbf16, #tpu.memory_space<vmem>>, %arg3: memref<128x128xbf16, #tpu.memory_space<vmem>>, %arg4: memref<128x128xbf16, #tpu.memory_space<vmem>>, %arg5: memref<1x128xf32, #tpu.memory_space<vmem>>, %arg6: memref<1x128xf32, #tpu.memory_space<vmem>>, %arg7: memref<1x128xf32, #tpu.memory_space<vmem>>, %arg8: memref<1xf32, #tpu.memory_space<smem>>, %arg9: memref<8x8xf32, #tpu.memory_space<vmem>>) attributes {dimension_semantics = [#tpu.dimension_semantics<parallel>], iteration_bounds = array<i64: 1>, scalar_prefetch = 0 : i64, scratch_operands = 0 : i64, tpu.core_type = #tpu.core_type<tc>, window_params = [{transform_indices = @transform_0, window_bounds = array<i64: 8, 128>}, {pipeline_mode = #tpu.pipeline_mode<synchronous>, transform_indices = @transform_1, window_bounds = array<i64: 8, 128>}, {pipeline_mode = #tpu.pipeline_mode<synchronous>, transform_indices = @transform_2, window_bounds = array<i64: 128, 128>}, {pipeline_mode = #tpu.pipeline_mode<synchronous>, transform_indices = @transform_3, window_bounds = array<i64: 128, 128>}, {pipeline_mode = #tpu.pipeline_mode<synchronous>, transform_indices = @transform_4, window_bounds = array<i64: 1, 128>}, {pipeline_mode = #tpu.pipeline_mode<synchronous>, transform_indices = @transform_5, window_bounds = array<i64: 1, 128>}, {pipeline_mode = #tpu.pipeline_mode<synchronous>, transform_indices = @transform_6, window_bounds = array<i64: 1, 128>}, {transform_indices = @transform_7, window_bounds = array<i64: 1>}, {transform_indices = @transform_8, window_bounds = array<i64: 8, 8>}]} {
    %c0 = arith.constant 0 : index
    %c0_0 = arith.constant 0 : index
    %0 = vector.load %arg1[%c0, %c0_0] : memref<8x128xbf16, #tpu.memory_space<vmem>>, vector<8x128xbf16>
    %c0_1 = arith.constant 0 : index
    %c0_2 = arith.constant 0 : index
    %1 = vector.load %arg3[%c0_1, %c0_2] : memref<128x128xbf16, #tpu.memory_space<vmem>>, vector<128x128xbf16>
    %cst = arith.constant dense<0.000000e+00> : vector<8x128xf32>
    %2 = tpu.matmul %0, %1, %cst {dimension_numbers = #tpu.dot_dimension_numbers<[1], [0], [0], [1], [0, 0, 1, 1], [], []>} : vector<8x128xbf16>, vector<128x128xbf16>, vector<8x128xf32> -> vector<8x128xf32>
    %c0_3 = arith.constant 0 : index
    %c0_4 = arith.constant 0 : index
    %3 = vector.load %arg5[%c0_3, %c0_4] : memref<1x128xf32, #tpu.memory_space<vmem>>, vector<1x128xf32>
    %4 = vector.broadcast %3 : vector<1x128xf32> to vector<8x128xf32>
    %5 = arith.addf %2, %4 : vector<8x128xf32>
    %c0_5 = arith.constant 0 : index
    %c0_6 = arith.constant 0 : index
    %6 = vector.load %arg2[%c0_5, %c0_6] : memref<8x128xbf16, #tpu.memory_space<vmem>>, vector<8x128xbf16>
    %c0_7 = arith.constant 0 : index
    %c0_8 = arith.constant 0 : index
    %7 = vector.load %arg4[%c0_7, %c0_8] : memref<128x128xbf16, #tpu.memory_space<vmem>>, vector<128x128xbf16>
    %cst_9 = arith.constant dense<0.000000e+00> : vector<8x128xf32>
    %8 = tpu.matmul %6, %7, %cst_9 {dimension_numbers = #tpu.dot_dimension_numbers<[1], [0], [0], [1], [0, 0, 1, 1], [], []>} : vector<8x128xbf16>, vector<128x128xbf16>, vector<8x128xf32> -> vector<8x128xf32>
    %c0_10 = arith.constant 0 : index
    %c0_11 = arith.constant 0 : index
    %9 = vector.load %arg6[%c0_10, %c0_11] : memref<1x128xf32, #tpu.memory_space<vmem>>, vector<1x128xf32>
    %10 = vector.broadcast %9 : vector<1x128xf32> to vector<8x128xf32>
    %11 = arith.addf %8, %10 : vector<8x128xf32>
    %12 = vector.shape_cast %5 : vector<8x128xf32> to vector<8x1x128xf32>
    %13 = vector.shape_cast %11 : vector<8x128xf32> to vector<1x8x128xf32>
    %14 = vector.broadcast %12 : vector<8x1x128xf32> to vector<8x8x128xf32>
    %15 = vector.broadcast %13 : vector<1x8x128xf32> to vector<8x8x128xf32>
    %16 = arith.addf %14, %15 : vector<8x8x128xf32>
    %cst_12 = arith.constant 0.000000e+00 : f32
    %17 = vector.broadcast %cst_12 : f32 to vector<8x8x128xf32>
    %18 = arith.maximumf %16, %17 : vector<8x8x128xf32>
    %c0_13 = arith.constant 0 : index
    %c0_14 = arith.constant 0 : index
    %19 = vector.load %arg7[%c0_13, %c0_14] : memref<1x128xf32, #tpu.memory_space<vmem>>, vector<1x128xf32>
    %20 = vector.shape_cast %19 : vector<1x128xf32> to vector<1x1x128xf32>
    %21 = vector.broadcast %20 : vector<1x1x128xf32> to vector<8x8x128xf32>
    %22 = arith.mulf %18, %21 : vector<8x8x128xf32>
    %cst_15 = arith.constant dense<0.000000e+00> : vector<8x8xf32>
    %23 = vector.multi_reduction <add>, %22, %cst_15 [2] : vector<8x8x128xf32> to vector<8x8xf32>
    %c0_16 = arith.constant 0 : index
    %24 = memref.load %arg8[%c0_16] : memref<1xf32, #tpu.memory_space<smem>>
    %25 = vector.broadcast %24 : f32 to vector<8x8xf32>
    %26 = arith.addf %23, %25 : vector<8x8xf32>
    %c0_17 = arith.constant 0 : index
    %c0_18 = arith.constant 0 : index
    %27 = vector.load %arg9[%c0_17, %c0_18] : memref<8x8xf32, #tpu.memory_space<vmem>>, vector<8x8xf32>
    tpu.vector_store %arg9[%c0_17, %c0_18], %26 {strides = array<i32>} : memref<8x8xf32, #tpu.memory_space<vmem>>, vector<8x8xf32>,
    return
  }
  func.func @transform_0(%arg0: i32) -> (i32, i32) {
    %c0_i32 = arith.constant 0 : i32
    %c0_i32_0 = arith.constant 0 : i32
    return %arg0, %c0_i32 : i32, i32
  }
  func.func @transform_1(%arg0: i32) -> (i32, i32) {
    %c0_i32 = arith.constant 0 : i32
    %c0_i32_0 = arith.constant 0 : i32
    %c0_i32_1 = arith.constant 0 : i32
    return %c0_i32, %c0_i32_0 : i32, i32
  }
  func.func @transform_2(%arg0: i32) -> (i32, i32) {
    %c0_i32 = arith.constant 0 : i32
    %c0_i32_0 = arith.constant 0 : i32
    %c0_i32_1 = arith.constant 0 : i32
    return %c0_i32, %c0_i32_0 : i32, i32
  }
  func.func @transform_3(%arg0: i32) -> (i32, i32) {
    %c0_i32 = arith.constant 0 : i32
    %c0_i32_0 = arith.constant 0 : i32
    %c0_i32_1 = arith.constant 0 : i32
    return %c0_i32, %c0_i32_0 : i32, i32
  }
  func.func @transform_4(%arg0: i32) -> (i32, i32) {
    %c0_i32 = arith.constant 0 : i32
    %c0_i32_0 = arith.constant 0 : i32
    %c0_i32_1 = arith.constant 0 : i32
    return %c0_i32, %c0_i32_0 : i32, i32
  }
  func.func @transform_5(%arg0: i32) -> (i32, i32) {
    %c0_i32 = arith.constant 0 : i32
    %c0_i32_0 = arith.constant 0 : i32
    %c0_i32_1 = arith.constant 0 : i32
    return %c0_i32, %c0_i32_0 : i32, i32
  }
  func.func @transform_6(%arg0: i32) -> (i32, i32) {
    %c0_i32 = arith.constant 0 : i32
    %c0_i32_0 = arith.constant 0 : i32
    %c0_i32_1 = arith.constant 0 : i32
    return %c0_i32, %c0_i32_0 : i32, i32
  }
  func.func @transform_7(%arg0: i32) -> i32 {
    %c0_i32 = arith.constant 0 : i32
    %c0_i32_0 = arith.constant 0 : i32
    return %c0_i32 : i32
  }
  func.func @transform_8(%arg0: i32) -> (i32, i32) {
    %c0_i32 = arith.constant 0 : i32
    %c0_i32_0 = arith.constant 0 : i32
    return %arg0, %c0_i32 : i32, i32
  }
}

</mosaic_0001>

<bundles_post_ra>
// kernel: mlp_decoder_forward.1
= control target key start
LH: loop header
LB: loop body
LE: loop exit
PB: predicated region body
PF: predicated region fallthrough
CT: control target
= control target key end

     0   :  { %14 = vsyncpa [#allocation4], 0  ;;  %s750_s0 = inlined_call_operand.vmem [shape: bf16[8,128], index: 0, kind: input, shape index: {}]   ;;  %s751_s1 = inlined_call_operand.vmem [shape: bf16[8,128], index: 1, kind: input, shape index: {}]   ;;  %s752_s2 = inlined_call_operand.hbm [shape: bf16[128,128], index: 2, kind: input, shape index: {}]   ;;  %s753_s3 = inlined_call_operand.hbm [shape: bf16[128,128], index: 3, kind: input, shape index: {}]   ;;  %s754_s4 = inlined_call_operand.vmem [shape: f32[1,128], index: 4, kind: input, shape index: {}]   ;;  %s755_s5 = inlined_call_operand.vmem [shape: f32[1,128], index: 5, kind: input, shape index: {}]   ;;  %s756_s6 = inlined_call_operand.vmem [shape: f32[1,128], index: 6, kind: input, shape index: {}]   ;;  %s757_s7 = inlined_call_operand.<no memory space> [shape: f32[1], index: 7, kind: input, shape index: {}]   ;;  %s758_s8 = inlined_call_operand.vmem [shape: f32[8,8], index: 8, kind: output, shape index: {}]  }
   0x1   :  { %15 = vsyncpa [#allocation6], 0  ;;  %s643_s27 = smov [#allocation3]   ;;  %s595_s9 = scalar_lea.hbm %s752_s2, 1024 }
   0x2   :  { %s25_s28 = sshll.u32 %s643_s27, 4  ;;  %p596_p0 = scmp.ne.s32.totalorder %s752_s2, %s595_s9  ;;  %s26_s28 = int_to_ptr.vmem [resolvable:$true] %s25_s28 }
   0x3   :  { %p599_p1 = scmp.lt.u32.totalorder %s595_s9, %s752_s2 }
   0x5   :  { %p601_p2 = pnand %p599_p1, %p596_p0 }
   0x7   :  { %604 = shalt.err (!%p601_p2)
}
   0x8   :  { %s605_s14 = scalar_lea.vmem %s26_s28, 1024  ;;  %p610_p4 = scmp.lt.s32.totalorder %s26_s28, %s26_s28 }
   0x9   :  { %p606_p3 = scmp.ne.s32.totalorder %s26_s28, %s605_s14  ;;  %p611_p5 = scmp.lt.s32.totalorder %s605_s14, %s605_s14 }
   0xb   :  { %p612_p6 = por %p611_p5, %p610_p4 }
   0xd   :  { %p613_p7 = pnand %p612_p6, %p606_p3 }
   0xf   :  { %616 = shalt.err (!%p613_p7)
}
  0x10   :  { %s644_s15 = smov 64   ;;  %s645_s16 = smov 4  }
  0x11   :  { %31 = dma.hbm_to_vmem [thread:$0]  %s752_s2, 1024, %s26_s28, [#allocation4], %s644_s15, %s644_s15, %s645_s16  }
  0x12   :  { %s646_s19 = smov [#allocation5]   ;;  %s617_s23 = scalar_lea.hbm %s753_s3, 1024 }
  0x13   :  { %s37_s20 = sshll.u32 %s646_s19, 4  ;;  %p618_p8 = scmp.ne.s32.totalorder %s753_s3, %s617_s23  ;;  %s38_s20 = int_to_ptr.vmem [resolvable:$true] %s37_s20 }
  0x14   :  { %p621_p9 = scmp.lt.u32.totalorder %s617_s23, %s753_s3 }
  0x16   :  { %p623_p10 = pnand %p621_p9, %p618_p8 }
  0x18   :  { %626 = shalt.err (!%p623_p10)
}
  0x19   :  { %s627_s29 = scalar_lea.vmem %s38_s20, 1024  ;;  %p632_p12 = scmp.lt.s32.totalorder %s38_s20, %s38_s20 }
  0x1a   :  { %p628_p11 = scmp.ne.s32.totalorder %s38_s20, %s627_s29  ;;  %p633_p13 = scmp.lt.s32.totalorder %s627_s29, %s627_s29 }
  0x1c   :  { %p634_p0 = por %p633_p13, %p632_p12 }
  0x1e   :  { %p635_p1 = pnand %p634_p0, %p628_p11 }
  0x20   :  { %638 = shalt.err (!%p635_p1)
}
  0x21   :  { %43 = dma.hbm_to_vmem [thread:$0]  %s753_s3, 1024, %s38_s20, [#allocation6], %s644_s15, %s644_s15, %s645_s16  }
  0x22   :  { %639 = dma.done.wait [#allocation4], 1024  }
  0x23   :  { %640 = vsyncadd [#allocation4], 4294966272 }
  0x24   :  { %641 = dma.done.wait [#allocation6], 1024  }
  0x25   :  { %642 = vsyncadd [#allocation6], 4294966272  ;;  %v647_v0 = vmov 0.0   ;;  %vm648_vm0 = vmmov 0   ;;  %v579_v1 = vld [vmem:[#allocation3] sm:$0xff]   ;;  %v580_v2 = vld [vmem:[#allocation3 + $0x8] sm:$0xff]   ;;  %v288_v19 = vlaneseq }
  0x26   :  { %532 = vmatprep.subr.bf16.mxu0 %v647_v0  ;;  %552 = vmatprep.subr.bf16.mxu1 %v647_v0  ;;  %v581_v3 = vld [vmem:[#allocation5] sm:$0xff]   ;;  %v583_v4 = vld [vmem:[#allocation5 + $0x8] sm:$0xff]   ;;  %v582_v5 = vld [vmem:[#allocation3 + $0x10] sm:$0xff]   ;;  %v649_v23 = vmov 1966171168   ;;  %vm472_vm1 = vcmask 1041409  }
  0x27   :  { %548 = vmatprep.mubr.msk.bf16.mxu0 %vm648_vm0, %v647_v0  ;;  %568 = vmatprep.mubr.msk.bf16.mxu1 %vm648_vm0, %v647_v0  ;;  %v585_v6 = vld [vmem:[#allocation5 + $0x10] sm:$0xff]   ;;  %v584_v7 = vld [vmem:[#allocation3 + $0x18] sm:$0xff]   ;;  %v586_v9 = vld [vmem:[#allocation3 + $0x20] sm:$0xff]   ;;  %v289_v20 = vshrl.u32 %v288_v19, 7  ;;  %v439_v21 = vand.u32 127, %v288_v19  ;;  %v286_v24 = vunpack.c.l.s4 %v649_v23  ;;  %v421_v23 = vstv %s757_s7 }
  0x28   :  { %533 = vmatpush3.bf16.msra.mxu0 %v579_v1  ;;  %553 = vmatpush3.bf16.msra.mxu1 %v581_v3  ;;  %v587_v8 = vld [vmem:[#allocation5 + $0x18] sm:$0xff]   ;;  %v589_v10 = vld [vmem:[#allocation5 + $0x20] sm:$0xff]   ;;  %v588_v11 = vld [vmem:[#allocation3 + $0x28] sm:$0xff]   ;;  %vm474_vm2 = vcmask 1042434   ;;  %vm476_vm3 = vcmask 1043459   ;;  %vm478_vm4 = vcmask 1044484  }
  0x29   :  { %534 = vmatprep.subr.bf16.mxu0 %v647_v0  ;;  %554 = vmatprep.subr.bf16.mxu1 %v647_v0  ;;  %v591_v12 = vld [vmem:[#allocation5 + $0x28] sm:$0xff]   ;;  %v590_v13 = vld [vmem:[#allocation3 + $0x30] sm:$0xff]   ;;  %v592_v15 = vld [vmem:[#allocation3 + $0x38] sm:$0xff]   ;;  %v725_v22 = vsub.s32 %v439_v21, %v289_v20  ;;  %v287_v25 = vunpack.c.0.s8 %v286_v24  ;;  %v335_v36 = vsub.s32 0, %v289_v20  ;;  %vm480_vm5 = vcmask 1045509  }
  0x2a   :  { %v593_v14 = vld [vmem:[#allocation5 + $0x30] sm:$0xff]   ;;  %v594_v16 = vld [vmem:[#allocation5 + $0x38] sm:$0xff]   ;;  %v59_v17 = vld [vmem:[%s750_s0] sm:$0xf]  ;;  %vm482_vm6 = vcmask 1046534   ;;  %vm484_vm7 = vcmask 1047559  }
  0x2b   :  { %v171_v18 = vld [vmem:[%s751_s1] sm:$0xf]  ;;  %v290_v27 = vsub.s32 %v287_v25, %v289_v20  ;;  %vm487_vm8 = vcmask 64512  }
  0x2c   :  { %535 = vmatpush3.bf16.msra.mxu0 %v580_v2  ;;  %555 = vmatpush3.bf16.msra.mxu1 %v583_v4  ;;  %v495_v26 = vld [vmem:[%s754_s4] ss:$0 sm:$0xff] }
  0x2d   :  { %536 = vmatprep.subr.bf16.mxu0 %v647_v0  ;;  %556 = vmatprep.subr.bf16.mxu1 %v647_v0  ;;  %v504_v32 = vld [vmem:[%s755_s5] ss:$0 sm:$0xff] }
  0x2e   :  { %v513_v54 = vld [vmem:[%s756_s6] ss:$0 sm:$0xff] }
  0x30   :  { %537 = vmatpush3.bf16.msra.mxu0 %v582_v5  ;;  %557 = vmatpush3.bf16.msra.mxu1 %v585_v6 }
  0x31   :  { %538 = vmatprep.subr.bf16.mxu0 %v647_v0  ;;  %558 = vmatprep.subr.bf16.mxu1 %v647_v0 }
  0x34   :  { %539 = vmatpush3.bf16.msra.mxu0 %v584_v7  ;;  %559 = vmatpush3.bf16.msra.mxu1 %v587_v8 }
  0x35   :  { %540 = vmatprep.subr.bf16.mxu0 %v647_v0  ;;  %560 = vmatprep.subr.bf16.mxu1 %v647_v0 }
  0x38   :  { %541 = vmatpush3.bf16.msra.mxu0 %v586_v9  ;;  %561 = vmatpush3.bf16.msra.mxu1 %v589_v10 }
  0x39   :  { %542 = vmatprep.subr.bf16.mxu0 %v647_v0  ;;  %562 = vmatprep.subr.bf16.mxu1 %v647_v0 }
  0x3c   :  { %543 = vmatpush3.bf16.msra.mxu0 %v588_v11  ;;  %563 = vmatpush3.bf16.msra.mxu1 %v591_v12 }
  0x3d   :  { %544 = vmatprep.subr.bf16.mxu0 %v647_v0  ;;  %564 = vmatprep.subr.bf16.mxu1 %v647_v0 }
  0x40   :  { %545 = vmatpush3.bf16.msra.mxu0 %v590_v13  ;;  %565 = vmatpush3.bf16.msra.mxu1 %v593_v14 }
  0x41   :  { %546 = vmatprep.subr.bf16.mxu0 %v647_v0  ;;  %566 = vmatprep.subr.bf16.mxu1 %v647_v0 }
  0x44   :  { %547 = vmatpush3.bf16.msra.mxu0 %v592_v15  ;;  %567 = vmatpush3.bf16.msra.mxu1 %v594_v16 }
  0x47   :  { %549 = vmatmul.mubr.bf16.vlgmr.msra.gmra.mrb[0].mxu0 %v59_v17  ;;  %569 = vmatmul.mubr.bf16.vlgmr.msra.gmra.mrb[0].mxu1 %v171_v18 }
 0x11a   :  { %v165_v28 = vpop.f32.mrb[0].mxu0  ;;  %v277_v33 = vpop.f32.mrb[0].mxu1 }
 0x11b   :  { %v166_v29 = vadd.f32 %v495_v26, %v165_v28  ;;  %v550_v30 = vpop.f32.mrb[1].mxu0  ;;  %v570_v38 = vpop.f32.mrb[1].mxu1  ;;  %v278_v43 = vadd.f32 %v504_v32, %v277_v33 }
 0x11c   :  { %v168_v31 = vpop.f32.mrb[2].mxu0  ;;  %v280_v39 = vpop.f32.mrb[2].mxu1 }
 0x11d   :  { %v284_v34 = vcombine.high %v166_v29, %v166_v29  ;;  %v291_v35 = vrot.slane %v166_v29, %v290_v27  ;;  %v551_v37 = vpop.f32.mrb[3].mxu0  ;;  %v571_v44 = vpop.f32.mrb[3].mxu1 }
 0x11f   :  { %v298_v40 = vrot.slane %v284_v34, %v290_v27  ;;  %v299_v41 = vcombine.high %v291_v35, %v291_v35  ;;  %v307_v42 = vrot.slane %v291_v35, %v290_v27 }
 0x121   :  { %v300_v45 = vcombine.high %v298_v40, %v298_v40  ;;  %v314_v46 = vrot.slane %v298_v40, %v290_v27  ;;  %v321_v47 = vrot.slane %v299_v41, %v290_v27  ;;  %v336_v48 = vrot.slane %v307_v42, %v335_v36 }
 0x122   :  { %v329_v49 = vcombine.high %v307_v42, %v307_v42 }
 0x123   :  { %v373_v50 = vadd.f32 %v336_v48, %v278_v43  ;;  %v340_v51 = vrot.slane %v321_v47, %v335_v36  ;;  %v331_v52 = vcombine.high %v321_v47, %v321_v47  ;;  %v352_v53 = vrot.slane %v314_v46, %v335_v36 }
 0x124   :  { %v344_v55 = vrot.slane %v329_v49, %v335_v36  ;;  %v328_v56 = vrot.slane %v300_v45, %v290_v27  ;;  %v330_v57 = vcombine.high %v314_v46, %v314_v46 }
 0x125   :  { %v381_v58 = vmax.f32 %v373_v50, 0.0  ;;  %v374_v59 = vadd.f32 %v340_v51, %v278_v43  ;;  %v348_v60 = vrot.slane %v331_v52, %v335_v36  ;;  %v377_v61 = vadd.f32 %v352_v53, %v278_v43 }
 0x126   :  { %v375_v62 = vadd.f32 %v344_v55, %v278_v43  ;;  %v356_v63 = vrot.slane %v328_v56, %v335_v36  ;;  %v360_v0 = vrot.slane %v330_v57, %v335_v36  ;;  %v332_v1 = vcombine.high %v328_v56, %v328_v56 }
 0x127   :  { %v396_v2 = vmul.f32 %v513_v54, %v381_v58  ;;  %v382_v3 = vmax.f32 %v374_v59, 0.0  ;;  %v376_v4 = vadd.f32 %v348_v60, %v278_v43  ;;  %v385_v13 = vmax.f32 %v377_v61, 0.0 }
 0x128   :  { %v383_v5 = vmax.f32 %v375_v62, 0.0  ;;  %v378_v6 = vadd.f32 %v356_v63, %v278_v43  ;;  %v379_v7 = vadd.f32 %v360_v0, %v278_v43  ;;  %v364_v8 = vrot.slane %v332_v1, %v335_v36 }
 0x129   :  { %404 = vadd.xlane.f32.xlu0 %v396_v2  ;;  %v384_v10 = vmax.f32 %v376_v4, 0.0  ;;  %v397_v12 = vmul.f32 %v513_v54, %v382_v3  ;;  %v400_v16 = vmul.f32 %v513_v54, %v385_v13 }
 0x12a   :  { %v398_v9 = vmul.f32 %v513_v54, %v383_v5  ;;  %v380_v11 = vadd.f32 %v364_v8, %v278_v43  ;;  %v386_v15 = vmax.f32 %v378_v6, 0.0  ;;  %v387_v17 = vmax.f32 %v379_v7, 0.0 }
 0x12b   :  { %v399_v14 = vmul.f32 %v513_v54, %v384_v10 }
 0x12c   :  { %408 = vadd.xlane.f32.xlu1 %v398_v9  ;;  %v401_v18 = vmul.f32 %v513_v54, %v386_v15  ;;  %v388_v19 = vmax.f32 %v380_v11, 0.0  ;;  %v402_v20 = vmul.f32 %v513_v54, %v387_v17 }
 0x12d   :  { %406 = vadd.xlane.f32.xlu0 %v397_v12 }
 0x12e   :  { %v403_v21 = vmul.f32 %v513_v54, %v388_v19 }
 0x130   :  { %410 = vadd.xlane.f32.xlu1 %v399_v14 }
 0x131   :  { %412 = vadd.xlane.f32.xlu0 %v400_v16 }
 0x134   :  { %414 = vadd.xlane.f32.xlu1 %v401_v18 }
 0x135   :  { %416 = vadd.xlane.f32.xlu0 %v402_v20 }
 0x138   :  { %418 = vadd.xlane.f32.xlu1 %v403_v21 }
 0x1b6   :  { %v405_v24 = vpop.xlane.xlu0 %404 }
 0x1b7   :  { %v422_v25 = vadd.f32 %v421_v23, %v405_v24 }
 0x1b9   :  { %v409_v26 = vpop.xlane.xlu1 %408  ;;  %v443_v30 = vrot.slane %v422_v25, %v725_v22 }
 0x1ba   :  { %v424_v27 = vadd.f32 %v421_v23, %v409_v26  ;;  %v407_v28 = vpop.xlane.xlu0 %406 }
 0x1bb   :  { %v423_v29 = vadd.f32 %v421_v23, %v407_v28 }
 0x1bc   :  { %v451_v33 = vrot.slane %v424_v27, %v725_v22 }
 0x1bd   :  { %v447_v31 = vrot.slane %v423_v29, %v725_v22  ;;  %v411_v32 = vpop.xlane.xlu1 %410 }
 0x1be   :  { %v425_v34 = vadd.f32 %v421_v23, %v411_v32  ;;  %v413_v35 = vpop.xlane.xlu0 %412 }
 0x1bf   :  { %v473_v36 = vsel %vm472_vm1, %v447_v31, %v443_v30  ;;  %v426_v37 = vadd.f32 %v421_v23, %v413_v35 }
 0x1c0   :  { %v475_v38 = vsel %vm474_vm2, %v451_v33, %v473_v36  ;;  %v455_v39 = vrot.slane %v425_v34, %v725_v22 }
 0x1c1   :  { %v459_v40 = vrot.slane %v426_v37, %v725_v22  ;;  %v415_v41 = vpop.xlane.xlu1 %414 }
 0x1c2   :  { %v477_v42 = vsel %vm476_vm3, %v455_v39, %v475_v38  ;;  %v427_v43 = vadd.f32 %v421_v23, %v415_v41  ;;  %v417_v44 = vpop.xlane.xlu0 %416 }
 0x1c3   :  { %v479_v45 = vsel %vm478_vm4, %v459_v40, %v477_v42  ;;  %v428_v46 = vadd.f32 %v421_v23, %v417_v44 }
 0x1c4   :  { %v463_v47 = vrot.slane %v427_v43, %v725_v22 }
 0x1c5   :  { %v467_v48 = vrot.slane %v428_v46, %v725_v22  ;;  %v419_v49 = vpop.xlane.xlu1 %418 }
 0x1c6   :  { %v481_v50 = vsel %vm480_vm5, %v463_v47, %v479_v45  ;;  %v429_v51 = vadd.f32 %v421_v23, %v419_v49 }
 0x1c7   :  { %v483_v52 = vsel %vm482_vm6, %v467_v48, %v481_v50 }
 0x1c8   :  { %v471_v53 = vrot.slane %v429_v51, %v725_v22 }
 0x1ca   :  { %v485_v54 = vsel %vm484_vm7, %v471_v53, %v483_v52 }
 0x1cb   :  { %488 = vst.msk [vmem:[%s758_s8] sm:$0xff] %vm487_vm8, %v485_v54 }
 0x1cc   :  { %493 = vsyncpa [#allocation4], 1 }
 0x1cd   :  { %494 = vsyncpa [#allocation6], 1 }

</bundles_post_ra>
